<compile_context>
chip_gen: v6e
topology: v6e:2x2x1
jax: 0.10.0
libtpu: 0.0.40
codegen_flags: <defaults>
</compile_context>

<pallas_src>
import functools

import jax
import jax.numpy as jnp
from jax import lax
from jax.experimental import pallas as pl
from jax.experimental.pallas import tpu as pltpu

_MiB = 1024 * 1024


def _spatial_gather_kernel(probs_ref, feats_ref, out_ref,
                           m_sc, l_sc, acc_sc, *, scale, hw, needs_mask):
    # probs_ref: (1, K, T), feats_ref: (1, Cb, T), out_ref: (1, K, Cb)
    # m_sc/l_sc: (K, 1) f32, acc_sc: (K, Cb) f32
    t = pl.program_id(2)

    @pl.when(t == 0)
    def _():
        m_sc[...] = jnp.full_like(m_sc, -jnp.inf)
        l_sc[...] = jnp.zeros_like(l_sc)
        acc_sc[...] = jnp.zeros_like(acc_sc)

    p = probs_ref[0].astype(jnp.float32)              # (K, T)
    f = feats_ref[0]                                  # (Cb, T), native dtype

    # scale applied BEFORE the max subtraction (matches torch semantics)
    z = scale * p

    if needs_mask:
        # Ragged HW: mask columns >= hw. Garbage probs -> -inf (exp -> 0),
        # garbage feats -> 0 so 0 * NaN can never pollute the MXU accumulator.
        tile = z.shape[-1]
        col = lax.broadcasted_iota(jnp.int32, (1, tile), 1) + t * tile
        valid = col < hw                                            # (1, T)
        z = jnp.where(valid, z, -jnp.inf)
        f = jnp.where(valid, f, jnp.zeros_like(f))

    m_prev = m_sc[...]
    m_new = jnp.maximum(m_prev, jnp.max(z, axis=-1, keepdims=True))  # (K,1)
    alpha = jnp.exp(m_prev - m_new)                                  # (K,1)
    e = jnp.exp(z - m_new)                                           # (K,T)

    l_sc[...] = alpha * l_sc[...] + jnp.sum(e, axis=-1, keepdims=True)

    # Contract over the last (lane) dim of both operands: (K,T)x(Cb,T)->(K,Cb).
    part = lax.dot_general(
        e.astype(f.dtype), f,
        dimension_numbers=(((1,), (1,)), ((), ())),
        preferred_element_type=jnp.float32,
    )
    acc_sc[...] = alpha * acc_sc[...] + part
    m_sc[...] = m_new

    @pl.when(t == pl.num_programs(2) - 1)
    def _():
        # Deferred normalization: one (K,Cb) scale per (batch, C-block).
        inv_l = pl.reciprocal(l_sc[...], approx=False)
        out_ref[0] = (acc_sc[...] * inv_l).astype(out_ref.dtype)


def _vmem_limit_bytes():
    """Generation-aware scoped-VMEM request (consistent with the tile budget)."""
    try:
        info = pltpu.get_tpu_info()
        phys = int(getattr(info, "vmem_capacity_bytes", 64 * _MiB))
    except Exception:  # unknown backend / emulator: be conservative
        phys = 64 * _MiB
    # 64 MiB-class chips (v7x) -> 32 MiB; 128 MiB-class (v5e/v6e) -> 64 MiB.
    return max(32 * _MiB, min(phys // 2, 64 * _MiB))


def _choose_hw_tile(hw, c_block, k, feats_itemsize, probs_itemsize,
                    vmem_limit, max_tile=16384):
    """Largest multiple-of-128 HW tile whose double-buffered input blocks
    (counted with per-array itemsizes) plus resident accumulator/output and
    a few f32 (K,T) temporaries fit inside the requested VMEM limit."""
    fixed = (k * c_block * 4              # acc scratch (f32)
             + 2 * k * 4                  # m / l scratch
             + 2 * k * c_block * feats_itemsize)   # double-buffered out block
    budget = int(0.8 * vmem_limit) - fixed
    per_col = (2 * (c_block * feats_itemsize + k * probs_itemsize)  # dbl-buf inputs
               + 4 * k * 4)                                         # f32 temps (z/e/...)
    hw128 = pl.cdiv(hw, 128) * 128
    tile_from_budget = (max(budget, 0) // max(per_col, 1)) // 128 * 128
    tile = min(max_tile, hw128, max(128, tile_from_budget))
    return max(128, (tile // 128) * 128)


def spatial_gather(feats, probs, scale=1.0, c_split=None):
    """feats: (B, C, H, W), probs: (B, K, H, W) -> (B, C, K, 1)."""
    B, C, H, W = feats.shape
    Bp, K, Hp, Wp = probs.shape
    assert (B, H, W) == (Bp, Hp, Wp)
    HW = H * W

    feats_flat = feats.reshape(B, C, HW)
    probs_flat = probs.reshape(B, K, HW)

    # Megacore lever (v7x): when B == 1, split C into 2 parallel blocks so both
    # TensorCores stream half of feats. Requires a 128-aligned C block for a
    # lane-aligned output BlockSpec. No-op on the batch>=2 / small-C cases.
    if c_split is None:
        c_split = 2 if (B == 1 and C % 256 == 0) else 1
    assert C % c_split == 0
    Cb = C // c_split

    f_isz = jnp.dtype(feats.dtype).itemsize
    p_isz = jnp.dtype(probs.dtype).itemsize

    vmem_limit = _vmem_limit_bytes()
    tile_hw = _choose_hw_tile(HW, Cb, K, f_isz, p_isz, vmem_limit)
    hw_tiles = pl.cdiv(HW, tile_hw)
    needs_mask = (HW % tile_hw) != 0

    kernel = functools.partial(_spatial_gather_kernel, scale=float(scale),
                               hw=HW, needs_mask=needs_mask)

    out = pl.pallas_call(
        kernel,
        out_shape=jax.ShapeDtypeStruct((B, K, C), feats.dtype),
        grid_spec=pltpu.PrefetchScalarGridSpec(
            num_scalar_prefetch=0,
            grid=(B, c_split, hw_tiles),
            in_specs=[
                pl.BlockSpec((1, K, tile_hw), lambda b, c, t: (b, 0, t)),
                pl.BlockSpec((1, Cb, tile_hw), lambda b, c, t: (b, c, t)),
            ],
            out_specs=pl.BlockSpec((1, K, Cb), lambda b, c, t: (b, 0, c)),
            scratch_shapes=[
                pltpu.VMEM((K, 1), jnp.float32),    # running max m
                pltpu.VMEM((K, 1), jnp.float32),    # running denom l
                pltpu.VMEM((K, Cb), jnp.float32),   # unnormalized accumulator
            ],
        ),
        compiler_params=pltpu.CompilerParams(
            dimension_semantics=("parallel", "parallel", "arbitrary"),
            vmem_limit_bytes=int(vmem_limit),
        ),
    )(probs_flat, feats_flat)

    # (B, K, C) -> (B, C, K) -> (B, C, K, 1)  (cheap glue; keeps C lane-dense
    # on the kernel output)
    return jnp.transpose(out, (0, 2, 1))[..., None]


def _reference(feats, probs, scale=1.0):
    B, C, H, W = feats.shape
    K = probs.shape[1]
    p = probs.reshape(B, K, -1)
    f = feats.reshape(B, C, -1).transpose(0, 2, 1)        # (B, HW, C)
    sm = jax.nn.softmax(scale * p, axis=2)
    ctx = jnp.einsum("bkh,bhc->bkc", sm, f)
    return jnp.transpose(ctx, (0, 2, 1))[..., None]


if __name__ == "__main__":
    key = jax.random.PRNGKey(0)
    k1, k2, k3, k4, k5, k6 = jax.random.split(key, 6)

    # Case 1: HW a multiple of the tile (16x16 = 256), B=2.
    B, C, K, H, W = 2, 32, 4, 16, 16
    feats = jax.random.normal(k1, (B, C, H, W), dtype=jnp.float32)
    probs = jax.random.normal(k2, (B, K, H, W), dtype=jnp.float32)

    out = spatial_gather(feats, probs, scale=1.0)
    jax.block_until_ready(out)
    ref = _reference(feats, probs, scale=1.0)
    assert out.shape == (B, C, K, 1), out.shape
    assert jnp.allclose(out, ref, atol=2e-5, rtol=2e-5), float(
        jnp.max(jnp.abs(out - ref))
    )

    # Case 2: ragged HW (10x13 = 130) exercising the in-kernel column mask,
    # and a non-unit scale.
    H2, W2 = 10, 13
    feats2 = jax.random.normal(k3, (B, C, H2, W2), dtype=jnp.float32)
    probs2 = jax.random.normal(k4, (B, K, H2, W2), dtype=jnp.float32)

    out2 = spatial_gather(feats2, probs2, scale=2.0)
    jax.block_until_ready(out2)
    ref2 = _reference(feats2, probs2, scale=2.0)
    assert out2.shape == (B, C, K, 1), out2.shape
    assert jnp.allclose(out2, ref2, atol=2e-5, rtol=2e-5), float(
        jnp.max(jnp.abs(out2 - ref2))
    )

    # Case 3: B=1 with C % 256 == 0 -> exercises the C-split (megacore) path,
    # combined with a ragged HW remainder and a fractional scale.
    B3, C3, K3, H3, W3 = 1, 256, 5, 9, 15
    feats3 = jax.random.normal(k5, (B3, C3, H3, W3), dtype=jnp.float32)
    probs3 = jax.random.normal(k6, (B3, K3, H3, W3), dtype=jnp.float32)

    out3 = spatial_gather(feats3, probs3, scale=0.5)
    jax.block_until_ready(out3)
    ref3 = _reference(feats3, probs3, scale=0.5)
    assert out3.shape == (B3, C3, K3, 1), out3.shape
    assert jnp.allclose(out3, ref3, atol=2e-5, rtol=2e-5), float(
        jnp.max(jnp.abs(out3 - ref3))
    )

    print("KERNEL_OK")
</pallas_src>

<mosaic_0001>
module attributes {stable_mosaic.version = 11 : i64} {
  func.func @_spatial_gather_kernel(%arg0: i32, %arg1: i32, %arg2: i32, %arg3: memref<1x4x256xf32, #tpu.memory_space<vmem>>, %arg4: memref<1x32x256xf32, #tpu.memory_space<vmem>>, %arg5: memref<1x4x32xf32, #tpu.memory_space<vmem>>, %arg6: memref<4x1xf32, #tpu.memory_space<vmem>>, %arg7: memref<4x1xf32, #tpu.memory_space<vmem>>, %arg8: memref<4x32xf32, #tpu.memory_space<vmem>>) attributes {dimension_semantics = [#tpu.dimension_semantics<parallel>, #tpu.dimension_semantics<parallel>, #tpu.dimension_semantics<arbitrary>], iteration_bounds = array<i64: 2, 1, 1>, scalar_prefetch = 0 : i64, scratch_operands = 3 : i64, tpu.core_type = #tpu.core_type<tc>, window_params = [{transform_indices = @transform_0, window_bounds = array<i64: 1, 4, 256>}, {transform_indices = @transform_1, window_bounds = array<i64: 1, 32, 256>}, {transform_indices = @transform_2, window_bounds = array<i64: 1, 4, 32>}]} {
    %c0_i32 = arith.constant 0 : i32
    %0 = arith.cmpi eq, %arg2, %c0_i32 : i32
    %1 = arith.extui %0 : i1 to i32
    %c0_i32_0 = arith.constant 0 : i32
    %2 = arith.cmpi ne, %1, %c0_i32_0 : i32
    scf.if %2 {
      %cst_23 = arith.constant 0xFF800000 : f32
      %34 = vector.broadcast %cst_23 : f32 to vector<4x1xf32>
      %c0_24 = arith.constant 0 : index
      %c0_25 = arith.constant 0 : index
      %35 = vector.load %arg6[%c0_24, %c0_25] : memref<4x1xf32, #tpu.memory_space<vmem>>, vector<4x1xf32>
      tpu.vector_store %arg6[%c0_24, %c0_25], %34 {strides = array<i32>} : memref<4x1xf32, #tpu.memory_space<vmem>>, vector<4x1xf32>,
      %cst_26 = arith.constant 0.000000e+00 : f32
      %36 = vector.broadcast %cst_26 : f32 to vector<4x1xf32>
      %c0_27 = arith.constant 0 : index
      %c0_28 = arith.constant 0 : index
      %37 = vector.load %arg7[%c0_27, %c0_28] : memref<4x1xf32, #tpu.memory_space<vmem>>, vector<4x1xf32>
      tpu.vector_store %arg7[%c0_27, %c0_28], %36 {strides = array<i32>} : memref<4x1xf32, #tpu.memory_space<vmem>>, vector<4x1xf32>,
      %cst_29 = arith.constant 0.000000e+00 : f32
      %38 = vector.broadcast %cst_29 : f32 to vector<4x32xf32>
      %c0_30 = arith.constant 0 : index
      %c0_31 = arith.constant 0 : index
      %39 = vector.load %arg8[%c0_30, %c0_31] : memref<4x32xf32, #tpu.memory_space<vmem>>, vector<4x32xf32>
      tpu.vector_store %arg8[%c0_30, %c0_31], %38 {strides = array<i32>} : memref<4x32xf32, #tpu.memory_space<vmem>>, vector<4x32xf32>,
    } else {
    }
    %c0 = arith.constant 0 : index
    %c0_1 = arith.constant 0 : index
    %c0_2 = arith.constant 0 : index
    %3 = vector.load %arg3[%c0, %c0_1, %c0_2] : memref<1x4x256xf32, #tpu.memory_space<vmem>>, vector<1x4x256xf32>
    %4 = vector.shape_cast %3 : vector<1x4x256xf32> to vector<4x256xf32>
    %c0_3 = arith.constant 0 : index
    %c0_4 = arith.constant 0 : index
    %c0_5 = arith.constant 0 : index
    %5 = vector.load %arg4[%c0_3, %c0_4, %c0_5] : memref<1x32x256xf32, #tpu.memory_space<vmem>>, vector<1x32x256xf32>
    %6 = vector.shape_cast %5 : vector<1x32x256xf32> to vector<32x256xf32>
    %cst = arith.constant 1.000000e+00 : f32
    %7 = vector.broadcast %cst : f32 to vector<4x256xf32>
    %8 = arith.mulf %7, %4 : vector<4x256xf32>
    %c0_6 = arith.constant 0 : index
    %c0_7 = arith.constant 0 : index
    %9 = vector.load %arg6[%c0_6, %c0_7] : memref<4x1xf32, #tpu.memory_space<vmem>>, vector<4x1xf32>
    %cst_8 = arith.constant dense<0xFF800000> : vector<4xf32>
    %10 = vector.multi_reduction <maximumf>, %8, %cst_8 [1] : vector<4x256xf32> to vector<4xf32>
    %11 = vector.shape_cast %10 : vector<4xf32> to vector<4x1xf32>
    %12 = arith.maximumf %9, %11 : vector<4x1xf32>
    %13 = arith.subf %9, %12 : vector<4x1xf32>
    %14 = math.exp %13 : vector<4x1xf32>
    %15 = vector.broadcast %12 : vector<4x1xf32> to vector<4x256xf32>
    %16 = arith.subf %8, %15 : vector<4x256xf32>
    %17 = math.exp %16 : vector<4x256xf32>
    %c0_9 = arith.constant 0 : index
    %c0_10 = arith.constant 0 : index
    %18 = vector.load %arg7[%c0_9, %c0_10] : memref<4x1xf32, #tpu.memory_space<vmem>>, vector<4x1xf32>
    %19 = arith.mulf %14, %18 : vector<4x1xf32>
    %cst_11 = arith.constant dense<0.000000e+00> : vector<4xf32>
    %20 = vector.multi_reduction <add>, %17, %cst_11 [1] : vector<4x256xf32> to vector<4xf32>
    %21 = vector.shape_cast %20 : vector<4xf32> to vector<4x1xf32>
    %22 = arith.addf %19, %21 : vector<4x1xf32>
    %c0_12 = arith.constant 0 : index
    %c0_13 = arith.constant 0 : index
    %23 = vector.load %arg7[%c0_12, %c0_13] : memref<4x1xf32, #tpu.memory_space<vmem>>, vector<4x1xf32>
    tpu.vector_store %arg7[%c0_12, %c0_13], %22 {strides = array<i32>} : memref<4x1xf32, #tpu.memory_space<vmem>>, vector<4x1xf32>,
    %cst_14 = arith.constant dense<0.000000e+00> : vector<4x32xf32>
    %24 = tpu.matmul %17, %6, %cst_14 {dimension_numbers = #tpu.dot_dimension_numbers<[1], [1], [0], [0], [0, 0, 1, 0], [], []>} : vector<4x256xf32>, vector<32x256xf32>, vector<4x32xf32> -> vector<4x32xf32>
    %c0_15 = arith.constant 0 : index
    %c0_16 = arith.constant 0 : index
    %25 = vector.load %arg8[%c0_15, %c0_16] : memref<4x32xf32, #tpu.memory_space<vmem>>, vector<4x32xf32>
    %26 = vector.broadcast %14 : vector<4x1xf32> to vector<4x32xf32>
    %27 = arith.mulf %26, %25 : vector<4x32xf32>
    %28 = arith.addf %27, %24 : vector<4x32xf32>
    %c0_17 = arith.constant 0 : index
    %c0_18 = arith.constant 0 : index
    %29 = vector.load %arg8[%c0_17, %c0_18] : memref<4x32xf32, #tpu.memory_space<vmem>>, vector<4x32xf32>
    tpu.vector_store %arg8[%c0_17, %c0_18], %28 {strides = array<i32>} : memref<4x32xf32, #tpu.memory_space<vmem>>, vector<4x32xf32>,
    %c0_19 = arith.constant 0 : index
    %c0_20 = arith.constant 0 : index
    %30 = vector.load %arg6[%c0_19, %c0_20] : memref<4x1xf32, #tpu.memory_space<vmem>>, vector<4x1xf32>
    tpu.vector_store %arg6[%c0_19, %c0_20], %12 {strides = array<i32>} : memref<4x1xf32, #tpu.memory_space<vmem>>, vector<4x1xf32>,
    %c0_i32_21 = arith.constant 0 : i32
    %31 = arith.cmpi eq, %arg2, %c0_i32_21 : i32
    %32 = arith.extui %31 : i1 to i32
    %c0_i32_22 = arith.constant 0 : i32
    %33 = arith.cmpi ne, %32, %c0_i32_22 : i32
    scf.if %33 {
      %c0_23 = arith.constant 0 : index
      %c0_24 = arith.constant 0 : index
      %34 = vector.load %arg7[%c0_23, %c0_24] : memref<4x1xf32, #tpu.memory_space<vmem>>, vector<4x1xf32>
      %35 = tpu.reciprocal %34 : vector<4x1xf32> -> vector<4x1xf32>
      %c0_25 = arith.constant 0 : index
      %c0_26 = arith.constant 0 : index
      %36 = vector.load %arg8[%c0_25, %c0_26] : memref<4x32xf32, #tpu.memory_space<vmem>>, vector<4x32xf32>
      %37 = vector.broadcast %35 : vector<4x1xf32> to vector<4x32xf32>
      %38 = arith.mulf %36, %37 : vector<4x32xf32>
      %c0_27 = arith.constant 0 : index
      %c0_28 = arith.constant 0 : index
      %c0_29 = arith.constant 0 : index
      %39 = vector.load %arg5[%c0_27, %c0_28, %c0_29] : memref<1x4x32xf32, #tpu.memory_space<vmem>>, vector<1x4x32xf32>
      %40 = vector.shape_cast %39 : vector<1x4x32xf32> to vector<4x32xf32>
      %41 = vector.shape_cast %38 : vector<4x32xf32> to vector<1x4x32xf32>
      tpu.vector_store %arg5[%c0_27, %c0_28, %c0_29], %41 {strides = array<i32>} : memref<1x4x32xf32, #tpu.memory_space<vmem>>, vector<1x4x32xf32>,
    } else {
    }
    return
  }
  func.func @transform_0(%arg0: i32, %arg1: i32, %arg2: i32) -> (i32, i32, i32) {
    %c0_i32 = arith.constant 0 : i32
    %c0_i32_0 = arith.constant 0 : i32
    return %arg0, %c0_i32, %arg2 : i32, i32, i32
  }
  func.func @transform_1(%arg0: i32, %arg1: i32, %arg2: i32) -> (i32, i32, i32) {
    %c0_i32 = arith.constant 0 : i32
    return %arg0, %arg1, %arg2 : i32, i32, i32
  }
  func.func @transform_2(%arg0: i32, %arg1: i32, %arg2: i32) -> (i32, i32, i32) {
    %c0_i32 = arith.constant 0 : i32
    %c0_i32_0 = arith.constant 0 : i32
    return %arg0, %c0_i32, %arg1 : i32, i32, i32
  }
}

</mosaic_0001>

<bundles_post_ra>
// kernel: tpu_custom_call.1
= control target key start
LH: loop header
LB: loop body
LE: loop exit
PB: predicated region body
PF: predicated region fallthrough
CT: control target
= control target key end

     0   :  { %7 = vsyncpa [#allocation6], 0  ;;  %s973_s0 = inlined_call_operand.hbm [shape: f32[2,4,256], index: 0, kind: input, shape index: {}]   ;;  %s974_s1 = inlined_call_operand.hbm [shape: f32[2,32,256], index: 1, kind: input, shape index: {}]   ;;  %s975_s2 = inlined_call_operand.hbm [shape: f32[2,4,32], index: 2, kind: output, shape index: {}]  }
   0x1   :  { %9 = vsyncpa [#allocation6 + $0x1], 0 }
   0x2   :  { %10 = vsyncpa [#allocation9], 0 }
   0x3   :  { %12 = vsyncpa [#allocation9 + $0x1], 0 }
   0x4   :  { %13 = vsyncpa [#allocation7], 0 }
   0x5   :  { %15 = vsyncpa [#allocation7 + $0x1], 0  ;;  %s787_s9 = smov 0   ;;  %s789_s10 = smov 0  }
   0x6   :  { %s791_s11 = smov 0   ;;  %s793_s12 = smov 0  }
   0x7   :  { %s795_s13 = smov 0   ;;  %s797_s14 = smov 0  }
   0x8 LB: > { %s519_s15 = sadd.s32 4294967295, %s761_s14   ;;  %s520_s16 = sadd.s32 4294967294, %s761_s14   ;;  %s761_s14 = sphi %s797_s14, %s21_s14   ;;  %s757_s13 = sphi %s795_s13, %s987_s13   ;;  %s753_s12 = sphi %s793_s12, %s986_s12   ;;  %s749_s11 = sphi %s791_s11, %s985_s11   ;;  %s745_s10 = sphi %s789_s10, %s984_s10   ;;  %s741_s9 = sphi %s787_s9, %s983_s9  }
   0x9   : > { %s40_s17 = sadd.s32 1, %s757_s13  ;;  %s49_s18 = sadd.s32 1, %s749_s11 }
   0xa   : > { %p42_p0 = scmp.ge.s32.totalorder %s40_s17, 2  ;;  %p56_p1 = scmp.ne.s32.totalorder %s749_s11, %s745_s10 }
   0xb   : > { %p57_p2 = scmp.eq.s32.totalorder %s761_s14, 0  ;;  %p62_p3 = scmp.ne.s32.totalorder %s745_s10, %s741_s9 }
   0xc   : > { %s989_s17 = smov (%p42_p0, %s40_s17), 0  ;;  %p63_p5 = scmp.eq.s32.totalorder %s519_s15, 0 }
   0xd   : > { %p828_p4 = por %p57_p2, %p56_p1  ;;  %s44_s20 = ssub.s32 %s757_s13, %s989_s17 }
   0xe   : > { %p118_p6 = scmp.eq.s32.totalorder %s519_s15, 1  ;;  %p47_p7 = scmp.eq.s32.totalorder %s44_s20, 0 }
   0xf   : > { %p834_p8 = por %p63_p5, %p62_p3  ;;  %p124_p10 = scmp.eq.s32.totalorder %s520_s16, 1 }
  0x10   : > { %p838_p9 = por %p118_p6, %p56_p1  ;;  %p556_p13 = scmp.lt.s32.totalorder %s761_s14, 2 }
  0x11   : > { %s843_s23 = scalar_select %p47_p7, %s749_s11, %s49_s18  }
  0x12   : > { %p845_p11 = por %p124_p10, %p62_p3  ;;  %s852_s25 = sand.u32 1, %s749_s11  }
  0x13   : > { %s523_s26 = sshll.u32 %s852_s25, 3  ;;  %s537_s27 = sshll.u32 %s757_s13, 7 }
  0x14   : > { %s156_s30 = scalar_lea.hbm %s973_s0, %s537_s27  ;;  %s148_s3 = scalar_lea.vmem [#allocation5], %s523_s26 }
  0x15   : > { %s158_s4 = sshll.u32 %s148_s3, 4  ;;  %p861_p0 = pnand %p556_p13, %p828_p4  ;;  %s159_s4 = int_to_ptr.vmem [resolvable:$true] %s158_s4 }
  0x16   : > { %p529_p1 = scmp.ge.s32.totalorder %s761_s14, 1  ;;  %p189_p2 = scmp.lt.s32.totalorder %s761_s14, 3 }
  0x17   : > { %s145_s6 = scalar_lea.sflag [#allocation6], %s852_s25  ;;  %p623_p3 = pneg %p861_p0 }
  0x18   : > { %s634_s7 = scalar_lea.vmem %s159_s4, 128  ;;  %s763_s8 = smov [#allocation5]  }
  0x19   : > { %p635_p5 = scmp.ne.s32.totalorder %s159_s4, %s634_s7  ;;  %s639_s15 = sshll.u32 %s763_s8, 4  ;;  %s640_s15 = int_to_ptr.vmem [resolvable:$false] %s639_s15 }
  0x1a   : > { %s641_s16 = scalar_lea.vmem %s640_s15, 256  ;;  %p642_p4 = scmp.lt.s32.totalorder %s159_s4, %s640_s15 }
  0x1b   : > { %p637_p6 = pnand %p635_p5, %p623_p3  ;;  %p643_p10 = scmp.lt.s32.totalorder %s641_s16, %s634_s7 }
  0x1d   : > { %p638_p7 = pneg %p637_p6  ;;  %p644_p13 = por %p643_p10, %p642_p4 }
  0x1f   : > { %p645_p12 = pnand %p644_p13, %p638_p7 }
  0x21   : > { %648 = shalt.err (!%p645_p12)
}
  0x22   : > { %548 = dma.hbm_to_vmem [thread:$0]  (!%p861_p0), %s156_s30, 128, %s159_s4, %s145_s6  }
  0x23   : > { %p879_p5 = pnand %p529_p1, %p189_p2  ;;  %s526_s19 = sshll.u32 %s852_s25, 6 }
  0x24   : > { %s538_s20 = sshll.u32 %s757_s13, 10  ;;  %s169_s29 = scalar_lea.vmem [#allocation8], %s526_s19 }
  0x25   : > { %s180_s28 = scalar_lea.hbm %s974_s1, %s538_s20  ;;  %s181_s3 = sshll.u32 %s169_s29, 4  ;;  %s182_s3 = int_to_ptr.vmem [resolvable:$true] %s181_s3 }
  0x26   : > { %s166_s7 = scalar_lea.sflag [#allocation9], %s852_s25  ;;  %s662_s8 = scalar_lea.vmem %s182_s3, 1024 }
  0x27   : > { %p663_p12 = scmp.ne.s32.totalorder %s182_s3, %s662_s8  ;;  %s764_s30 = smov [#allocation8]  }
  0x28   : > { %s667_s4 = sshll.u32 %s764_s30, 4  ;;  %s668_s4 = int_to_ptr.vmem [resolvable:$false] %s667_s4 }
  0x29   : > { %p665_p6 = pnand %p663_p12, %p623_p3  ;;  %s669_s6 = scalar_lea.vmem %s668_s4, 2048 }
  0x2a   : > { %p670_p1 = scmp.lt.s32.totalorder %s182_s3, %s668_s4  ;;  %p671_p2 = scmp.lt.s32.totalorder %s669_s6, %s662_s8 }
  0x2b   : > { %p666_p7 = pneg %p665_p6 }
  0x2c   : > { %p672_p4 = por %p671_p2, %p670_p1 }
  0x2e   : > { %p673_p10 = pnand %p672_p4, %p666_p7 }
  0x30   : > { %676 = shalt.err (!%p673_p10)
}
  0x31   : > { %s765_s15 = smov 256   ;;  %s766_s16 = smov 16  }
  0x32   : > { %551 = dma.hbm_to_vmem [thread:$0]  (!%p861_p0), %s180_s28, 1024, %s182_s3, %s166_s7, %s765_s15, %s765_s15, %s766_s16  }
  0x33   : > { %193 = sbr.rel (%p879_p5) target bundleno = 656 (0x290), region = 28  ;;  %s897_s25 = sand.u32 (!%p879_p5), 1, %s745_s10  }
  0x34   : > { %s530_s19 = sshll.u32 (!%p879_p5), %s897_s25, 3  ;;  %s196_s20 = scalar_lea.sflag (!%p879_p5), [#allocation6], %s897_s25 }
  0x35   : > { %s199_s26 = scalar_lea.vmem (!%p879_p5), [#allocation5], %s530_s19 }
  0x38   : > { %728 = dma.done.wait (%p834_p8), %s196_s20, 128  }
  0x39   : > { %730 = vsyncadd (%p834_p8), %s196_s20, 4294967168  ;;  %s531_s5 = sshll.u32 %s897_s25, 6  ;;  %s205_s18 = scalar_lea.sflag [#allocation9], %s897_s25 }
  0x3a   : > { %s907_s27 = scalar_lea.vmem [#allocation8], %s531_s5 }
  0x3b   : > { %732 = dma.done.wait (%p834_p8), %s205_s18, 1024  }
  0x3c   : > { %734 = vsyncadd (%p834_p8), %s205_s18, 4294966272  ;;  %vm241_vm0 = vcmask 3072   ;;  %v767_v0 = vmov -inf   ;;  %vm259_vm1 = vcmask 1043456   ;;  %v246_v1 = vld [vmem:[%s199_s26] sm:$0xff]  ;;  %v768_v6 = vmov 0  }
  0x3d   : > { %242 = vst.msk [vmem:[#allocation2] sm:$0xf] %vm241_vm0, %v767_v0  ;;  %v257_v2 = vcombine.high %v246_v1, %v246_v1  ;;  %v260_v3 = vsel %vm259_vm1, %v246_v1, -inf  ;;  %612 = vset.pattern.permute.xlu0 %v768_v6  ;;  %613 = vset.pattern.permute.xlu1 %v768_v6  ;;  %v769_v7 = vmov 0.0   ;;  %v254_v12 = vld [vmem:[%s907_s27 + $0x38] sm:$0xff]  ;;  %v253_v13 = vld [vmem:[%s907_s27 + $0x30] sm:$0xff]  ;;  %v276_v22 = vlaneseq }
  0x3e   : > { %243 = vst.msk [vmem:[#allocation3] sm:$0xf] %vm241_vm0, %v769_v7  ;;  %v252_v14 = vld [vmem:[%s907_s27 + $0x28] sm:$0xff]  ;;  %321 = vmatprep.subr.mxu0 %v254_v12  ;;  %v251_v15 = vld [vmem:[%s907_s27 + $0x20] sm:$0xff]  ;;  %v250_v16 = vld [vmem:[%s907_s27 + $0x18] sm:$0xff]  ;;  %vm244_vm2 = vcmask 257024  }
  0x3f   : > { %v261_v4 = vsel %vm259_vm1, %v257_v2, -inf  ;;  %322 = vmatpush1.xpose.msra.mxu0 %v253_v13  ;;  %v249_v17 = vld [vmem:[%s907_s27 + $0x10] sm:$0xff]  ;;  %v248_v18 = vld [vmem:[%s907_s27 + $0x8] sm:$0xff]  ;;  %v247_v19 = vld [vmem:[%s907_s27] sm:$0xff]  ;;  %v770_v20 = vmov 839922192  }
  0x40   : > { %v262_v5 = vmax.f32 %v260_v3, %v261_v4  ;;  %323 = vmatprep.subr.mxu0 %v252_v14  ;;  %v274_v21 = vunpack.c.l.s4 %v770_v20  ;;  %v277_v24 = vshrl.u32 %v276_v22, 7  ;;  %245 = vst.msk [vmem:[#allocation4] sm:$0xf] %vm244_vm2, %v769_v7  ;;  %s532_s21 = sshll.u32 %s897_s25, 2  ;;  %s534_s28 = sshll.u32 %s753_s12, 6 }
  0x41   : > { %s233_s29 = scalar_lea.vmem [#allocation10], %s532_s21  ;;  %s404_s30 = scalar_lea.hbm %s975_s2, %s534_s28 }
  0x42   : > { %263 = vmax.xlane.f32.xlu0 %v262_v5  ;;  %v275_v23 = vunpack.c.0.s8 %v274_v21  ;;  %s406_s3 = sshll.u32 %s233_s29, 4  ;;  %s392_s4 = scalar_lea.sflag [#allocation7], %s897_s25  ;;  %s407_s3 = int_to_ptr.vmem [resolvable:$true] %s406_s3 }
  0x43   : > { %324 = vmatpush1.xpose.msra.mxu0 %v251_v15  ;;  %s677_s6 = scalar_lea.vmem %s407_s3, 64  ;;  %s771_s15 = smov [#allocation10]  }
  0x44   : > { %v255_v8 = vld [vmem:[#allocation2] sm:$0xf]  ;;  %325 = vmatprep.subr.mxu0 %v250_v16  ;;  %v278_v25 = vsub.s32 %v275_v23, %v277_v24  ;;  %p678_p8 = scmp.ne.s32.totalorder %s407_s3, %s677_s6  ;;  %s681_s12 = sshll.u32 %s771_s15, 4  ;;  %s682_s12 = int_to_ptr.vmem [resolvable:$false] %s681_s12 }
  0x45   : > { %v284_v37 = vld [vmem:[#allocation3] sm:$0xf]  ;;  %s683_s16 = scalar_lea.vmem %s682_s12, 128  ;;  %p684_p13 = scmp.lt.s32.totalorder %s407_s3, %s682_s12 }
  0x46   : > { %p679_p0 = pnand %p678_p8, %p838_p9  ;;  %p685_p5 = scmp.lt.s32.totalorder %s683_s16, %s677_s6 }
  0x47   : > { %326 = vmatpush1.xpose.msra.mxu0 %v249_v17  ;;  %v367_v43 = vld [vmem:[#allocation4] sm:$0xf] }
  0x48   : > { %327 = vmatprep.subr.mxu0 %v248_v18  ;;  %p680_p3 = pneg %p679_p0  ;;  %p686_p12 = por %p685_p5, %p684_p13 }
  0x4a   : > { %p687_p6 = pnand %p686_p12, %p680_p3 }
  0x4b   : > { %328 = vmatpush1.xpose.msra.mxu0 %v247_v19 }
  0xcb   : > { %v264_v9 = vpop.xlane.xlu0 %263 }
  0xcc   : > { %v265_v10 = vmax.f32 %v255_v8, %v264_v9 }
  0xce   : > { %v266_v11 = vsub.f32 %v255_v8, %v265_v10  ;;  %377 = vst.msk [vmem:[#allocation2] sm:$0xf] %vm241_vm0, %v265_v10  ;;  %271 = vperm.xlu0 %612, %v265_v10  }
  0xd0   : > { %v267_v35 = vmul.f32 1.442695, %v266_v11 }
 0x149   : > { %v272_v26 = vpop.permute.xlu0 %271 }
 0x14a   : > { %v279_v27 = vrot.slane %v272_v26, %v278_v25 }
 0x14c   : > { %v281_v28 = vsub.f32 %v246_v1, %v279_v27 }
 0x14e   : > { %v282_v29 = vmul.f32 1.442695, %v281_v28 }
 0x150   : > { %615 = vpow2.f32 %v282_v29 }
 0x151   : > { %617 = vpow2.f32 %v267_v35 }
 0x15d   : > { %v616_v30 = vpop.eup %615 }
 0x15e   : > { %v287_v31 = vcombine.high %v616_v30, %v616_v30  ;;  %v289_v32 = vsel %vm259_vm1, %v616_v30, 0.0  ;;  %v618_v36 = vpop.eup %617 }
 0x15f   : > { %v285_v38 = vmul.f32 %v618_v36, %v284_v37 }
 0x160   : > { %361 = vmatprep.mubr.f32.mxu0 %v287_v31  ;;  %v290_v33 = vsel %vm259_vm1, %v287_v31, 0.0 }
 0x161   : > { %362 = vmatmul.mubr.f32.vlgmr.msra.gmra.mxu0 %v616_v30  ;;  %v291_v34 = vadd.f32 %v290_v33, %v289_v32 }
 0x163   : > { %292 = vadd.xlane.f32.xlu1 %v291_v34 }
 0x174   : > { %370 = vperm.xlu1 %613, %v618_v36  }
 0x1ec   : > { %v293_v39 = vpop.xlane.xlu1 %292 }
 0x1ed   : > { %v294_v40 = vadd.f32 %v293_v39, %v285_v38 }
 0x1ef   : > { %296 = vst.msk [vmem:[#allocation3] sm:$0xf] %vm241_vm0, %v294_v40 }
 0x1f0   : > { %v371_v44 = vpop.permute.xlu1 %370 }
 0x1f1   : > { %v373_v45 = vmul.f32 %v371_v44, %v367_v43 }
 0x1f6   : > { %v381_v41 = vld [vmem:[#allocation3] sm:$0xf] }
 0x1f7   : > { %619 = vrcp.f32 %v381_v41 }
 0x204   : > { %v620_v42 = vpop.eup %619 }
 0x205   : > { %386 = vperm.xlu1 %613, %v620_v42  }
 0x221   : > { %v363_v46 = vpop.f32.mrf.mxu0 }
 0x222   : > { %v374_v47 = vadd.f32 %v373_v45, %v363_v46 }
 0x223   : > { %v365_v48 = vpop.f32.mrf.mxu0 }
 0x224   : > { %376 = vst.msk [vmem:[#allocation4] sm:$0xf] %vm244_vm2, %v374_v47 }
 0x22b   : > { %v383_v49 = vld [vmem:[#allocation4] sm:$0xf] }
 0x280   : > { %v387_v50 = vpop.permute.xlu1 %386 }
 0x281   : > { %v389_v51 = vmul.f32 %v387_v50, %v383_v49 }
 0x283   : > { %390 = vst.msk [vmem:[%s233_s29] sm:$0xf] %vm244_vm2, %v389_v51 }
 0x284   : > { %690 = shalt.err (!%p687_p6)
}
 0x285   : > { %s691_s19 = scalar_lea.hbm %s404_s30, 64  ;;  %s695_s26 = scalar_lea.hbm %s975_s2, 128 }
 0x286   : > { %p692_p7 = scmp.ne.s32.totalorder %s404_s30, %s691_s19  ;;  %p696_p4 = scmp.lt.s32.totalorder %s404_s30, %s975_s2 }
 0x287   : > { %p697_p10 = scmp.lt.s32.totalorder %s695_s26, %s691_s19 }
 0x288   : > { %p693_p1 = pnand %p692_p7, %p838_p9 }
 0x289   : > { %p698_p8 = por %p697_p10, %p696_p4 }
 0x28a   : > { %p694_p2 = pneg %p693_p1 }
 0x28c   : > { %p699_p0 = pnand %p698_p8, %p694_p2 }
 0x28e   : > { %702 = shalt.err (!%p699_p0)
}
 0x28f   : > { %543 = dma.vmem_to_hbm [thread:$0]  (%p838_p9), %s407_s3, 64, %s404_s30, %s392_s4  }
 0x290 PF: > { %s418_s27 = sand.u32 1, %s741_s9   ;;  %p982_p3 = scmp.ge.s32.totalorder %s761_s14, 2 }
 0x291   : > { %s419_s21 = scalar_lea.sflag [#allocation7], %s418_s27 }
 0x292   : > { %p553_p13 = pnand %p982_p3, %p845_p11 }
 0x294   : > { %p554_p5 = pneg %p553_p13 }
 0x296   : > { %736 = dma.done.wait (%p554_p5), %s419_s21, 64  }
 0x297   : > { %738 = vsyncadd (%p554_p5), %s419_s21, 4294967232  ;;  %s21_s14 = sadd.s32 1, %s761_s14   ;;  %s983_s9 = smov %s745_s10 }
 0x298   : > { %p18_p12 = scmp.ge.s32.totalorder %s21_s14, 4   ;;  %s984_s10 = smov %s749_s11 }
 0x299   : > { %s985_s11 = smov %s843_s23  ;;  %s986_s12 = smov %s757_s13 }
 0x29a   : > { %s987_s13 = smov %s989_s17  ;;  %20 = sbr.rel (!%p18_p12) target bundleno = 8 (0x8), region = 94 }
 0x29f   :  { %424 = vsyncpa [#allocation6], 1 }
 0x2a0   :  { %426 = vsyncpa [#allocation6 + $0x1], 1 }
 0x2a1   :  { %427 = vsyncpa [#allocation9], 1 }
 0x2a2   :  { %429 = vsyncpa [#allocation9 + $0x1], 1 }
 0x2a3   :  { %430 = vsyncpa [#allocation7], 1 }
 0x2a4   :  { %432 = vsyncpa [#allocation7 + $0x1], 1 }

</bundles_post_ra>
